<compile_context>
chip_gen: v5e
topology: v5e:2x2
jax: 0.10.0
libtpu: 0.0.40
codegen_flags: <defaults>
</compile_context>

<pallas_src>
import numpy as np

import jax
import jax.numpy as jnp
from jax import lax
from jax.experimental import pallas as pl
from jax.experimental.pallas import tpu as pltpu

_LANE = 128
_SUBLANE = 8


# --------------------------------------------------------------------------
# Primary path: zero-DMA aliased identity (split+cat == identity).
# --------------------------------------------------------------------------
def _touch_kernel(x_ref, o_ref):
    # Output buffer IS the input buffer (aliased); register a read/write dep
    # so the aliased output materializes without moving any bytes.
    pltpu.touch(o_ref)


def _identity_alias(x):
    return pl.pallas_call(
        _touch_kernel,
        out_shape=jax.ShapeDtypeStruct(x.shape, x.dtype),
        in_specs=[pl.BlockSpec(memory_space=pl.ANY)],
        out_specs=pl.BlockSpec(memory_space=pl.ANY),
        input_output_aliases={0: 0},
    )(x)


# --------------------------------------------------------------------------
# Fallback path: lane-dense tiled copy (only used if the touch path cannot
# be lowered on this backend).
# --------------------------------------------------------------------------
def _copy_kernel(x_ref, o_ref):
    o_ref[...] = x_ref[...]


def _pick_row_tile(rows, max_rows):
    """Largest divisor of `rows` that is a multiple of 8 and <= max_rows."""
    cap = min(rows, max_rows)
    cap -= cap % _SUBLANE
    for t in range(cap, _SUBLANE - 1, -_SUBLANE):
        if rows % t == 0:
            return t
    return _SUBLANE


def _identity_copy(x):
    shape = x.shape
    n = x.size
    # Pad the flat view up to a multiple of one f32 vreg (8*128) so every
    # shape goes through the tiled, lane-dense path (no whole-array block).
    pad = (-n) % (_SUBLANE * _LANE)
    flat = x.reshape(n)
    if pad:
        flat = jnp.pad(flat, (0, pad))
    rows = flat.size // _LANE

    # ~4096-row f32 tiles (2 MiB) keep in+out double-buffering well under the
    # scoped-VMEM default on every generation (v5e 16 MiB, v6e/v7x 32 MiB)
    # while amortizing the ~0.35us per-grid-step overhead.
    row_tile = _pick_row_tile(rows, 4096)
    # Keep at least 2 grid steps when possible so the "parallel" axis can be
    # sharded across v7x's two TensorCores.
    if rows // row_tile < 2 and rows >= 2 * _SUBLANE:
        row_tile = _pick_row_tile(rows, max(rows // 2, _SUBLANE))

    out = pl.pallas_call(
        _copy_kernel,
        out_shape=jax.ShapeDtypeStruct((rows, _LANE), flat.dtype),
        grid=(rows // row_tile,),
        in_specs=[pl.BlockSpec((row_tile, _LANE), lambda i: (i, 0))],
        out_specs=pl.BlockSpec((row_tile, _LANE), lambda i: (i, 0)),
        compiler_params=pltpu.CompilerParams(
            dimension_semantics=("parallel",)),
    )(flat.reshape(rows, _LANE))

    out = out.reshape(rows * _LANE)
    if pad:
        out = out[:n]
    return out.reshape(shape)


def _probe_alias_path():
    """True iff the zero-DMA ANY-space alias path lowers on this backend."""
    try:
        jax.jit(_identity_alias).lower(
            jax.ShapeDtypeStruct((_SUBLANE, _LANE), jnp.float32)).compile()
        return True
    except Exception:
        return False


_USE_ALIAS_PATH = _probe_alias_path()


def _pallas_identity(x):
    return _identity_alias(x) if _USE_ALIAS_PATH else _identity_copy(x)


# --------------------------------------------------------------------------
# Module.forward equivalent.
# --------------------------------------------------------------------------
def module_forward(x):
    """Returns (cat(split(x,[1,1,1,1],1),1), split(x,[1,1,1,1],1))."""
    # split([1,1,1,1], dim=1) + cat(dim=1) is a bitwise identity -> the Pallas
    # call simply re-exports x's buffer (zero HBM traffic when x is donated).
    concatenated = _pallas_identity(x)
    # Slice from x (bitwise identical to `concatenated`) so the slice copies
    # have no data dependency on the pallas_call.
    splits = tuple(lax.slice_in_dim(x, i, i + 1, axis=1) for i in range(4))
    return concatenated, splits


if __name__ == "__main__":
    key = jax.random.PRNGKey(0)
    x = jax.random.normal(key, (2, 4, 16, 16), dtype=jnp.float32)

    # Host reference copy taken BEFORE the call: x is donated below, so it
    # must not be read afterwards.
    x_host = np.asarray(x)

    # Donating x lets the aliased pallas output reuse x's buffer with no
    # defensive copy in front of the kernel.
    fwd = jax.jit(module_forward, donate_argnums=0)
    concat, splits = fwd(x)
    jax.block_until_ready((concat, splits))

    # Correctness checks against the PyTorch semantics (vs. the host copy).
    assert concat.shape == x_host.shape
    assert np.array_equal(np.asarray(concat), x_host)
    assert len(splits) == 4
    for i, s in enumerate(splits):
        assert s.shape == (x_host.shape[0], 1, x_host.shape[2], x_host.shape[3])
        assert np.array_equal(np.asarray(s), x_host[:, i:i + 1])

    print("KERNEL_OK")
</pallas_src>

<mosaic_0001>
module attributes {stable_mosaic.version = 11 : i64} {
  func.func @_copy_kernel(%arg0: i32, %arg1: memref<8x128xf32, #tpu.memory_space<vmem>>, %arg2: memref<8x128xf32, #tpu.memory_space<vmem>>) attributes {dimension_semantics = [#tpu.dimension_semantics<parallel>], iteration_bounds = array<i64: 2>, scalar_prefetch = 0 : i64, scratch_operands = 0 : i64, tpu.core_type = #tpu.core_type<tc>, window_params = [{transform_indices = @transform_0, window_bounds = array<i64: 8, 128>}, {transform_indices = @transform_1, window_bounds = array<i64: 8, 128>}]} {
    %c0 = arith.constant 0 : index
    %c0_0 = arith.constant 0 : index
    %0 = vector.load %arg1[%c0, %c0_0] : memref<8x128xf32, #tpu.memory_space<vmem>>, vector<8x128xf32>
    %c0_1 = arith.constant 0 : index
    %c0_2 = arith.constant 0 : index
    %1 = vector.load %arg2[%c0_1, %c0_2] : memref<8x128xf32, #tpu.memory_space<vmem>>, vector<8x128xf32>
    tpu.vector_store %arg2[%c0_1, %c0_2], %0 {strides = array<i32>} : memref<8x128xf32, #tpu.memory_space<vmem>>, vector<8x128xf32>,
    return
  }
  func.func @transform_0(%arg0: i32) -> (i32, i32) {
    %c0_i32 = arith.constant 0 : i32
    %c0_i32_0 = arith.constant 0 : i32
    return %arg0, %c0_i32 : i32, i32
  }
  func.func @transform_1(%arg0: i32) -> (i32, i32) {
    %c0_i32 = arith.constant 0 : i32
    %c0_i32_0 = arith.constant 0 : i32
    return %arg0, %c0_i32 : i32, i32
  }
}

</mosaic_0001>

<bundles_post_ra>
// kernel: module_forward.1
= control target key start
LH: loop header
LB: loop body
LE: loop exit
PB: predicated region body
PF: predicated region fallthrough
CT: control target
= control target key end

     0   :  { %s188_s6 = smov 0   ;;  %s208_s0 = inlined_call_operand.vmem [shape: f32[16,128], index: 0, kind: input, shape index: {}]   ;;  %s209_s1 = inlined_call_operand.vmem [shape: f32[16,128], index: 1, kind: output, shape index: {}]  }
   0x1 LB: > { %s167_s7 = sadd.s32 4294967295, %s190_s6   ;;  %p171_p0 = scmp.ge.s32.totalorder %s190_s6, 1  ;;  %s190_s6 = sphi %s188_s6, %s11_s6  }
   0x2   : > { %p86_p1 = scmp.lt.s32.totalorder %s190_s6, 3 }
   0x4   : > { %p87_p2 = pnand %p171_p0, %p86_p1 }
   0x5   : > { %p104_p3 = scmp.lt.s32.totalorder (!%p87_p2), %s167_s7, 1 }
   0x6   : > { %90 = sbr.rel (%p87_p2) target bundleno = 16 (0x10), region = 24 }
   0xb   : > { %s211_s7 = smov (!%p104_p3, %s167_s7), 1 }
   0xc   : > { %s172_s8 = sshll.u32 %s211_s7, 3 }
   0xd   : > { %s107_s11 = scalar_lea.vmem %s208_s0, %s172_s8  ;;  %s111_s14 = scalar_lea.vmem %s209_s1, %s172_s8 }
   0xe   : > { %v112_v0 = vld [vmem:[%s107_s11] sm:$0xff] }
   0xf   : > { %113 = vst [vmem:[%s111_s14] sm:$0xff] %v112_v0 }
  0x10 PF: > { %s11_s6 = sadd.s32 1, %s190_s6  }
  0x11   : > { %p8_p4 = scmp.ge.s32.totalorder %s11_s6, 4  }
  0x13   :  { %10 = sbr.rel (!%p8_p4) target bundleno = 1 (0x1), region = 54 }

</bundles_post_ra>
